<compile_context>
chip_gen: v5e
topology: v5e:2x2
jax: 0.10.0
libtpu: 0.0.40
codegen_flags: <defaults>
</compile_context>

<pallas_src>
import functools

import jax
import jax.numpy as jnp
from jax.experimental import pallas as pl
from jax.experimental.pallas import tpu as pltpu


def _const_spec(shape, index_map):
    """BlockSpec for a block whose index never changes: single-buffer it."""
    buffered = getattr(pl, "Buffered", None)
    if buffered is not None:
        try:
            return pl.BlockSpec(shape, index_map, pipeline_mode=buffered(1))
        except TypeError:  # older JAX without pipeline_mode kwarg
            pass
    return pl.BlockSpec(shape, index_map)


# ----------------------------- kernels --------------------------------------

def _ffn_resident_kernel(x_ref, g1_ref, be1_ref, w1_ref, b1_ref,
                         w2_ref, b2_ref, g2_ref, be2_ref, o_ref,
                         acc_ref, *, eps, th):
    """All weights VMEM-resident; hidden dim processed in static chunks of th."""
    H = w1_ref.shape[1]
    n_chunks = H // th

    # ---- LayerNorm #1 (one-pass stats), f32 math ----
    x = x_ref[...].astype(jnp.float32)
    mu = jnp.mean(x, axis=-1, keepdims=True)
    var = jnp.mean(x * x, axis=-1, keepdims=True) - mu * mu
    y = (x - mu) * jax.lax.rsqrt(var + eps)
    y = y * g1_ref[...].astype(jnp.float32) + be1_ref[...].astype(jnp.float32)

    y_bf = y.astype(jnp.bfloat16)  # MXU operand, hoisted out of the chunk loop

    # ---- Linear -> ReLU -> Linear, chunked over H, scratch accumulator ----
    # n_chunks is static & small (weights are resident), so a fully-unrolled
    # Python loop with static ref slices is used (no loop-carry copies).
    for c in range(n_chunks):
        lo, hi = c * th, (c + 1) * th
        h = jnp.dot(y_bf, w1_ref[:, lo:hi], preferred_element_type=jnp.float32)
        h = h + b1_ref[:, lo:hi].astype(jnp.float32)
        h = jnp.maximum(h, 0.0).astype(jnp.bfloat16)
        z = jnp.dot(h, w2_ref[lo:hi, :], preferred_element_type=jnp.float32)
        if c == 0:
            acc_ref[...] = z
        else:
            acc_ref[...] += z

    # ---- residual (on normed input, matching the module) + LayerNorm #2 ----
    r = y + acc_ref[...] + b2_ref[...].astype(jnp.float32)
    mu2 = jnp.mean(r, axis=-1, keepdims=True)
    var2 = jnp.mean(r * r, axis=-1, keepdims=True) - mu2 * mu2
    out = (r - mu2) * jax.lax.rsqrt(var2 + eps)
    out = out * g2_ref[...].astype(jnp.float32) + be2_ref[...].astype(jnp.float32)
    o_ref[...] = out.astype(o_ref.dtype)


def _ffn_stream_kernel(x_ref, g1_ref, be1_ref, w1_ref, b1_ref,
                       w2_ref, b2_ref, g2_ref, be2_ref, o_ref,
                       y_ref, acc_ref, *, eps):
    """Weights streamed through the BlockSpec pipeline over a grid axis on H."""
    k = pl.program_id(1)

    @pl.when(k == 0)
    def _():
        x = x_ref[...].astype(jnp.float32)
        mu = jnp.mean(x, axis=-1, keepdims=True)
        var = jnp.mean(x * x, axis=-1, keepdims=True) - mu * mu
        y = (x - mu) * jax.lax.rsqrt(var + eps)
        y_ref[...] = (y * g1_ref[...].astype(jnp.float32)
                      + be1_ref[...].astype(jnp.float32))
        acc_ref[...] = jnp.zeros_like(acc_ref)

    y_bf = y_ref[...].astype(jnp.bfloat16)
    h = jnp.dot(y_bf, w1_ref[...], preferred_element_type=jnp.float32)
    h = h + b1_ref[...].astype(jnp.float32)
    h = jnp.maximum(h, 0.0).astype(jnp.bfloat16)
    acc_ref[...] += jnp.dot(h, w2_ref[...], preferred_element_type=jnp.float32)

    @pl.when(k == pl.num_programs(1) - 1)
    def _():
        r = y_ref[...] + acc_ref[...] + b2_ref[...].astype(jnp.float32)
        mu2 = jnp.mean(r, axis=-1, keepdims=True)
        var2 = jnp.mean(r * r, axis=-1, keepdims=True) - mu2 * mu2
        out = (r - mu2) * jax.lax.rsqrt(var2 + eps)
        out = (out * g2_ref[...].astype(jnp.float32)
               + be2_ref[...].astype(jnp.float32))
        o_ref[...] = out.astype(o_ref.dtype)


# ----------------------------- wrapper ---------------------------------------

def feed_forward_block(x, params, *, eps=1e-5, tm=None, th=None,
                       force_stream=False):
    """x: (B, S, D) float32. params: dict from init_params."""
    B, S, D = x.shape
    M = B * S
    H = params["w1"].shape[1]  # D * mult

    # Hidden chunk width: largest of 512/256/128 dividing H, else full H.
    if th is None:
        th = next((c for c in (512, 256, 128) if H % c == 0), H)
    assert H % th == 0, "hidden chunk width must divide H"

    # Row tile: big default, clamped to M, multiple of 8 sublanes.
    if tm is None:
        tm = 512
    tm = max(8, min(tm, M))
    tm = max(8, (tm // 8) * 8)

    # VMEM capacity / budget, sized per generation with headroom.
    try:
        vmem_cap = int(pltpu.get_tpu_info().vmem_capacity_bytes)
    except Exception:
        vmem_cap = 64 * 1024 * 1024  # conservative (v7x per-TC)
    budget = int(0.80 * vmem_cap)

    param_bytes = (H + 6 * D) * 4  # biases + LN params (f32)

    def _resident_need(tm_):
        weights = 2 * D * H * 2 + param_bytes            # single-buffered bf16
        rows = 2 * 2 * tm_ * D * 4                       # x + out, double-buffered
        scratch = tm_ * D * 4                            # accumulator
        temps = 8 * tm_ * D * 4 + 6 * tm_ * th * 4       # y, y_bf, h, LN temps
        return weights + rows + scratch + temps + (2 << 20)

    def _stream_need(tm_):
        weights = 2 * (2 * D * th * 2 + th * 4) + param_bytes  # dbl-buffered chunks
        rows = 2 * 2 * tm_ * D * 4
        scratch = 2 * tm_ * D * 4                        # y + accumulator
        temps = 8 * tm_ * D * 4 + 6 * tm_ * th * 4
        return weights + rows + scratch + temps + (2 << 20)

    streaming = bool(force_stream) or _resident_need(tm) > budget
    need_fn = _stream_need if streaming else _resident_need

    while tm > 64 and need_fn(tm) > budget:
        tm = max(64, tm // 2)
    tm = max(8, (tm // 8) * 8)

    vmem_limit = int(min(max(need_fn(tm), 16 << 20), int(0.85 * vmem_cap)))

    n_rows = pl.cdiv(M, tm)  # partial trailing tile handled (masked) by Pallas

    # 2-D, lane-dense operand views.
    xf = x.reshape(M, D)
    g1 = params["g1"].reshape(1, D)
    be1 = params["be1"].reshape(1, D)
    b1 = params["b1"].reshape(1, H)
    b2 = params["b2"].reshape(1, D)
    g2 = params["g2"].reshape(1, D)
    be2 = params["be2"].reshape(1, D)
    w1 = params["w1"].astype(jnp.bfloat16)
    w2 = params["w2"].astype(jnp.bfloat16)

    if not streaming:
        row_spec = pl.BlockSpec((tm, D), lambda i: (i, 0))
        cvec = lambda shape: _const_spec(shape, lambda i: (0, 0))
        cost = pl.CostEstimate(
            flops=4 * M * D * H, transcendentals=2 * M,
            bytes_accessed=2 * M * D * 4 + 2 * D * H * 2 + param_bytes)
        out = pl.pallas_call(
            functools.partial(_ffn_resident_kernel, eps=eps, th=th),
            out_shape=jax.ShapeDtypeStruct((M, D), x.dtype),
            grid=(n_rows,),
            in_specs=[row_spec,
                      cvec((1, D)), cvec((1, D)),     # norm.weight / bias
                      cvec((D, H)), cvec((1, H)),     # ff[0].weight.T / bias
                      cvec((H, D)), cvec((1, D)),     # ff[3].weight.T / bias
                      cvec((1, D)), cvec((1, D))],    # post_norm.weight / bias
            out_specs=row_spec,
            scratch_shapes=[pltpu.VMEM((tm, D), jnp.float32)],
            compiler_params=pltpu.CompilerParams(
                dimension_semantics=("parallel",),
                vmem_limit_bytes=vmem_limit),
            cost_estimate=cost,
        )(xf, g1, be1, w1, b1, w2, b2, g2, be2)
    else:
        n_k = H // th
        row_spec = pl.BlockSpec((tm, D), lambda i, k: (i, 0))
        cvec = lambda shape: _const_spec(shape, lambda i, k: (0, 0))
        cost = pl.CostEstimate(
            flops=4 * M * D * H, transcendentals=2 * M,
            bytes_accessed=2 * M * D * 4 + n_rows * 2 * D * H * 2 + param_bytes)
        out = pl.pallas_call(
            functools.partial(_ffn_stream_kernel, eps=eps),
            out_shape=jax.ShapeDtypeStruct((M, D), x.dtype),
            grid=(n_rows, n_k),
            in_specs=[row_spec,
                      cvec((1, D)), cvec((1, D)),
                      pl.BlockSpec((D, th), lambda i, k: (0, k)),   # w1 chunk
                      pl.BlockSpec((1, th), lambda i, k: (0, k)),   # b1 chunk
                      pl.BlockSpec((th, D), lambda i, k: (k, 0)),   # w2 chunk
                      cvec((1, D)), cvec((1, D)), cvec((1, D))],
            out_specs=row_spec,
            scratch_shapes=[pltpu.VMEM((tm, D), jnp.float32),   # y (normed x)
                            pltpu.VMEM((tm, D), jnp.float32)],  # accumulator
            compiler_params=pltpu.CompilerParams(
                dimension_semantics=("parallel", "arbitrary"),
                vmem_limit_bytes=vmem_limit),
            cost_estimate=cost,
        )(xf, g1, be1, w1, b1, w2, b2, g2, be2)

    return out.reshape(B, S, D)


# ----------------------------- params / references ---------------------------

def init_params(key, dim, mult):
    """Parameter init mirroring the PyTorch module's shapes (weights stored bf16)."""
    hidden = dim * mult
    k1, k2, k3, k4 = jax.random.split(key, 4)
    lim1 = 1.0 / (dim ** 0.5)
    lim2 = 1.0 / (hidden ** 0.5)
    return {
        # LayerNorm (self.norm): weight=1, bias=0
        "g1": jnp.ones((dim,), jnp.float32),
        "be1": jnp.zeros((dim,), jnp.float32),
        # Linear(dim, dim*mult): stored transposed -> (dim, hidden), bf16 for MXU
        "w1": jax.random.uniform(k1, (dim, hidden), jnp.float32,
                                 -lim1, lim1).astype(jnp.bfloat16),
        "b1": jax.random.uniform(k2, (hidden,), jnp.float32, -lim1, lim1),
        # Linear(dim*mult, dim): stored transposed -> (hidden, dim), bf16 for MXU
        "w2": jax.random.uniform(k3, (hidden, dim), jnp.float32,
                                 -lim2, lim2).astype(jnp.bfloat16),
        "b2": jax.random.uniform(k4, (dim,), jnp.float32, -lim2, lim2),
        # LayerNorm (self.post_norm)
        "g2": jnp.ones((dim,), jnp.float32),
        "be2": jnp.zeros((dim,), jnp.float32),
    }


def _layer_norm(v, g, b, eps):
    mu = jnp.mean(v, axis=-1, keepdims=True)
    var = jnp.mean((v - mu) ** 2, axis=-1, keepdims=True)
    return (v - mu) / jnp.sqrt(var + eps) * g + b


def _reference_matched(x, params, eps=1e-5):
    """Pure-JAX reference with the kernel's precision (bf16 dot inputs, f32 acc)."""
    y = _layer_norm(x.astype(jnp.float32), params["g1"], params["be1"], eps)
    h = jnp.dot(y.astype(jnp.bfloat16), params["w1"],
                preferred_element_type=jnp.float32) + params["b1"]
    h = jnp.maximum(h, 0.0)
    z = jnp.dot(h.astype(jnp.bfloat16), params["w2"],
                preferred_element_type=jnp.float32) + params["b2"]
    return _layer_norm(y + z, params["g2"], params["be2"], eps)


def _reference_f32(x, params, eps=1e-5):
    """Full-f32 reference of the PyTorch forward (dropout=0)."""
    y = _layer_norm(x.astype(jnp.float32), params["g1"], params["be1"], eps)
    h = jnp.maximum(y @ params["w1"].astype(jnp.float32) + params["b1"], 0.0)
    z = h @ params["w2"].astype(jnp.float32) + params["b2"]
    return _layer_norm(y + z, params["g2"], params["be2"], eps)


if __name__ == "__main__":
    B, S, D, MULT = 2, 16, 128, 4   # small but lane-dense / MXU-friendly shapes
    key = jax.random.PRNGKey(0)
    kx, kp = jax.random.split(key)

    x = jax.random.normal(kx, (B, S, D), jnp.float32)
    params = init_params(kp, D, MULT)

    ref_m = _reference_matched(x, params)
    ref_f = _reference_f32(x, params)

    # 1) Default path: weights VMEM-resident, single row tile.
    out = jax.block_until_ready(feed_forward_block(x, params))
    assert out.shape == (B, S, D)
    assert jnp.allclose(out, ref_m, atol=2e-3, rtol=2e-3), "resident: mismatch vs matched ref"
    assert jnp.allclose(out, ref_f, atol=3e-2, rtol=3e-2), "resident: mismatch vs f32 ref"

    # 2) Resident path, multiple row tiles incl. a masked partial trailing tile,
    #    multiple hidden chunks.
    out2 = jax.block_until_ready(feed_forward_block(x, params, tm=24, th=128))
    assert jnp.allclose(out2, ref_m, atol=2e-3, rtol=2e-3), "partial-tile: mismatch"

    # 3) Streaming fallback path (grid over H, pl.when init/finalize) exercised
    #    at small shapes so both code paths are validated.
    out3 = jax.block_until_ready(
        feed_forward_block(x, params, tm=16, th=128, force_stream=True))
    assert jnp.allclose(out3, ref_m, atol=2e-3, rtol=2e-3), "streaming: mismatch"

    print("KERNEL_OK")
</pallas_src>

<mosaic_0001>
module attributes {stable_mosaic.version = 11 : i64} {
  func.func @_ffn_resident_kernel(%arg0: i32, %arg1: memref<32x128xf32, #tpu.memory_space<vmem>>, %arg2: memref<1x128xf32, #tpu.memory_space<vmem>>, %arg3: memref<1x128xf32, #tpu.memory_space<vmem>>, %arg4: memref<128x512xbf16, #tpu.memory_space<vmem>>, %arg5: memref<1x512xf32, #tpu.memory_space<vmem>>, %arg6: memref<512x128xbf16, #tpu.memory_space<vmem>>, %arg7: memref<1x128xf32, #tpu.memory_space<vmem>>, %arg8: memref<1x128xf32, #tpu.memory_space<vmem>>, %arg9: memref<1x128xf32, #tpu.memory_space<vmem>>, %arg10: memref<32x128xf32, #tpu.memory_space<vmem>>, %arg11: memref<32x128xf32, #tpu.memory_space<vmem>>) attributes {dimension_semantics = [#tpu.dimension_semantics<parallel>], iteration_bounds = array<i64: 1>, scalar_prefetch = 0 : i64, scratch_operands = 1 : i64, tpu.core_type = #tpu.core_type<tc>, window_params = [{transform_indices = @transform_0, window_bounds = array<i64: 32, 128>}, {pipeline_mode = #tpu.pipeline_mode<synchronous>, transform_indices = @transform_1, window_bounds = array<i64: 1, 128>}, {pipeline_mode = #tpu.pipeline_mode<synchronous>, transform_indices = @transform_2, window_bounds = array<i64: 1, 128>}, {pipeline_mode = #tpu.pipeline_mode<synchronous>, transform_indices = @transform_3, window_bounds = array<i64: 128, 512>}, {pipeline_mode = #tpu.pipeline_mode<synchronous>, transform_indices = @transform_4, window_bounds = array<i64: 1, 512>}, {pipeline_mode = #tpu.pipeline_mode<synchronous>, transform_indices = @transform_5, window_bounds = array<i64: 512, 128>}, {pipeline_mode = #tpu.pipeline_mode<synchronous>, transform_indices = @transform_6, window_bounds = array<i64: 1, 128>}, {pipeline_mode = #tpu.pipeline_mode<synchronous>, transform_indices = @transform_7, window_bounds = array<i64: 1, 128>}, {pipeline_mode = #tpu.pipeline_mode<synchronous>, transform_indices = @transform_8, window_bounds = array<i64: 1, 128>}, {transform_indices = @transform_9, window_bounds = array<i64: 32, 128>}]} {
    %c0 = arith.constant 0 : index
    %c0_0 = arith.constant 0 : index
    %0 = vector.load %arg1[%c0, %c0_0] : memref<32x128xf32, #tpu.memory_space<vmem>>, vector<32x128xf32>
    %cst = arith.constant dense<0.000000e+00> : vector<32xf32>
    %1 = vector.multi_reduction <add>, %0, %cst [1] : vector<32x128xf32> to vector<32xf32>
    %2 = vector.shape_cast %1 : vector<32xf32> to vector<32x1xf32>
    %cst_1 = arith.constant 1.280000e+02 : f32
    %3 = vector.broadcast %cst_1 : f32 to vector<32x1xf32>
    %4 = arith.divf %2, %3 : vector<32x1xf32>
    %5 = arith.mulf %0, %0 : vector<32x128xf32>
    %cst_2 = arith.constant dense<0.000000e+00> : vector<32xf32>
    %6 = vector.multi_reduction <add>, %5, %cst_2 [1] : vector<32x128xf32> to vector<32xf32>
    %7 = vector.shape_cast %6 : vector<32xf32> to vector<32x1xf32>
    %cst_3 = arith.constant 1.280000e+02 : f32
    %8 = vector.broadcast %cst_3 : f32 to vector<32x1xf32>
    %9 = arith.divf %7, %8 : vector<32x1xf32>
    %10 = arith.mulf %4, %4 : vector<32x1xf32>
    %11 = arith.subf %9, %10 : vector<32x1xf32>
    %12 = vector.broadcast %4 : vector<32x1xf32> to vector<32x128xf32>
    %13 = arith.subf %0, %12 : vector<32x128xf32>
    %cst_4 = arith.constant 9.99999974E-6 : f32
    %14 = vector.broadcast %cst_4 : f32 to vector<32x1xf32>
    %15 = arith.addf %11, %14 : vector<32x1xf32>
    %16 = math.rsqrt %15 : vector<32x1xf32>
    %17 = vector.broadcast %16 : vector<32x1xf32> to vector<32x128xf32>
    %18 = arith.mulf %13, %17 : vector<32x128xf32>
    %c0_5 = arith.constant 0 : index
    %c0_6 = arith.constant 0 : index
    %19 = vector.load %arg2[%c0_5, %c0_6] : memref<1x128xf32, #tpu.memory_space<vmem>>, vector<1x128xf32>
    %20 = vector.broadcast %19 : vector<1x128xf32> to vector<32x128xf32>
    %21 = arith.mulf %18, %20 : vector<32x128xf32>
    %c0_7 = arith.constant 0 : index
    %c0_8 = arith.constant 0 : index
    %22 = vector.load %arg3[%c0_7, %c0_8] : memref<1x128xf32, #tpu.memory_space<vmem>>, vector<1x128xf32>
    %23 = vector.broadcast %22 : vector<1x128xf32> to vector<32x128xf32>
    %24 = arith.addf %21, %23 : vector<32x128xf32>
    %25 = arith.truncf %24 : vector<32x128xf32> to vector<32x128xbf16>
    %c0_9 = arith.constant 0 : index
    %c0_10 = arith.constant 0 : index
    %26 = vector.load %arg4[%c0_9, %c0_10] : memref<128x512xbf16, #tpu.memory_space<vmem>>, vector<128x512xbf16>
    %cst_11 = arith.constant dense<0.000000e+00> : vector<32x512xf32>
    %27 = tpu.matmul %25, %26, %cst_11 {dimension_numbers = #tpu.dot_dimension_numbers<[1], [0], [0], [1], [0, 0, 1, 1], [], []>} : vector<32x128xbf16>, vector<128x512xbf16>, vector<32x512xf32> -> vector<32x512xf32>
    %c0_12 = arith.constant 0 : index
    %c0_13 = arith.constant 0 : index
    %28 = vector.load %arg5[%c0_12, %c0_13] : memref<1x512xf32, #tpu.memory_space<vmem>>, vector<1x512xf32>
    %29 = vector.broadcast %28 : vector<1x512xf32> to vector<32x512xf32>
    %30 = arith.addf %27, %29 : vector<32x512xf32>
    %cst_14 = arith.constant 0.000000e+00 : f32
    %31 = vector.broadcast %cst_14 : f32 to vector<32x512xf32>
    %32 = arith.maximumf %30, %31 : vector<32x512xf32>
    %33 = arith.truncf %32 : vector<32x512xf32> to vector<32x512xbf16>
    %c0_15 = arith.constant 0 : index
    %c0_16 = arith.constant 0 : index
    %34 = vector.load %arg6[%c0_15, %c0_16] : memref<512x128xbf16, #tpu.memory_space<vmem>>, vector<512x128xbf16>
    %cst_17 = arith.constant dense<0.000000e+00> : vector<32x128xf32>
    %35 = tpu.matmul %33, %34, %cst_17 {dimension_numbers = #tpu.dot_dimension_numbers<[1], [0], [0], [1], [0, 0, 1, 1], [], []>} : vector<32x512xbf16>, vector<512x128xbf16>, vector<32x128xf32> -> vector<32x128xf32>
    %c0_18 = arith.constant 0 : index
    %c0_19 = arith.constant 0 : index
    %36 = vector.load %arg11[%c0_18, %c0_19] : memref<32x128xf32, #tpu.memory_space<vmem>>, vector<32x128xf32>
    tpu.vector_store %arg11[%c0_18, %c0_19], %35 {strides = array<i32>} : memref<32x128xf32, #tpu.memory_space<vmem>>, vector<32x128xf32>,
    %c0_20 = arith.constant 0 : index
    %c0_21 = arith.constant 0 : index
    %37 = vector.load %arg11[%c0_20, %c0_21] : memref<32x128xf32, #tpu.memory_space<vmem>>, vector<32x128xf32>
    %38 = arith.addf %24, %37 : vector<32x128xf32>
    %c0_22 = arith.constant 0 : index
    %c0_23 = arith.constant 0 : index
    %39 = vector.load %arg7[%c0_22, %c0_23] : memref<1x128xf32, #tpu.memory_space<vmem>>, vector<1x128xf32>
    %40 = vector.broadcast %39 : vector<1x128xf32> to vector<32x128xf32>
    %41 = arith.addf %38, %40 : vector<32x128xf32>
    %cst_24 = arith.constant dense<0.000000e+00> : vector<32xf32>
    %42 = vector.multi_reduction <add>, %41, %cst_24 [1] : vector<32x128xf32> to vector<32xf32>
    %43 = vector.shape_cast %42 : vector<32xf32> to vector<32x1xf32>
    %cst_25 = arith.constant 1.280000e+02 : f32
    %44 = vector.broadcast %cst_25 : f32 to vector<32x1xf32>
    %45 = arith.divf %43, %44 : vector<32x1xf32>
    %46 = arith.mulf %41, %41 : vector<32x128xf32>
    %cst_26 = arith.constant dense<0.000000e+00> : vector<32xf32>
    %47 = vector.multi_reduction <add>, %46, %cst_26 [1] : vector<32x128xf32> to vector<32xf32>
    %48 = vector.shape_cast %47 : vector<32xf32> to vector<32x1xf32>
    %cst_27 = arith.constant 1.280000e+02 : f32
    %49 = vector.broadcast %cst_27 : f32 to vector<32x1xf32>
    %50 = arith.divf %48, %49 : vector<32x1xf32>
    %51 = arith.mulf %45, %45 : vector<32x1xf32>
    %52 = arith.subf %50, %51 : vector<32x1xf32>
    %53 = vector.broadcast %45 : vector<32x1xf32> to vector<32x128xf32>
    %54 = arith.subf %41, %53 : vector<32x128xf32>
    %cst_28 = arith.constant 9.99999974E-6 : f32
    %55 = vector.broadcast %cst_28 : f32 to vector<32x1xf32>
    %56 = arith.addf %52, %55 : vector<32x1xf32>
    %57 = math.rsqrt %56 : vector<32x1xf32>
    %58 = vector.broadcast %57 : vector<32x1xf32> to vector<32x128xf32>
    %59 = arith.mulf %54, %58 : vector<32x128xf32>
    %c0_29 = arith.constant 0 : index
    %c0_30 = arith.constant 0 : index
    %60 = vector.load %arg8[%c0_29, %c0_30] : memref<1x128xf32, #tpu.memory_space<vmem>>, vector<1x128xf32>
    %61 = vector.broadcast %60 : vector<1x128xf32> to vector<32x128xf32>
    %62 = arith.mulf %59, %61 : vector<32x128xf32>
    %c0_31 = arith.constant 0 : index
    %c0_32 = arith.constant 0 : index
    %63 = vector.load %arg9[%c0_31, %c0_32] : memref<1x128xf32, #tpu.memory_space<vmem>>, vector<1x128xf32>
    %64 = vector.broadcast %63 : vector<1x128xf32> to vector<32x128xf32>
    %65 = arith.addf %62, %64 : vector<32x128xf32>
    %c0_33 = arith.constant 0 : index
    %c0_34 = arith.constant 0 : index
    %66 = vector.load %arg10[%c0_33, %c0_34] : memref<32x128xf32, #tpu.memory_space<vmem>>, vector<32x128xf32>
    tpu.vector_store %arg10[%c0_33, %c0_34], %65 {strides = array<i32>} : memref<32x128xf32, #tpu.memory_space<vmem>>, vector<32x128xf32>,
    return
  }
  func.func @transform_0(%arg0: i32) -> (i32, i32) {
    %c0_i32 = arith.constant 0 : i32
    %c0_i32_0 = arith.constant 0 : i32
    return %arg0, %c0_i32 : i32, i32
  }
  func.func @transform_1(%arg0: i32) -> (i32, i32) {
    %c0_i32 = arith.constant 0 : i32
    %c0_i32_0 = arith.constant 0 : i32
    %c0_i32_1 = arith.constant 0 : i32
    return %c0_i32, %c0_i32_0 : i32, i32
  }
  func.func @transform_2(%arg0: i32) -> (i32, i32) {
    %c0_i32 = arith.constant 0 : i32
    %c0_i32_0 = arith.constant 0 : i32
    %c0_i32_1 = arith.constant 0 : i32
    return %c0_i32, %c0_i32_0 : i32, i32
  }
  func.func @transform_3(%arg0: i32) -> (i32, i32) {
    %c0_i32 = arith.constant 0 : i32
    %c0_i32_0 = arith.constant 0 : i32
    %c0_i32_1 = arith.constant 0 : i32
    return %c0_i32, %c0_i32_0 : i32, i32
  }
  func.func @transform_4(%arg0: i32) -> (i32, i32) {
    %c0_i32 = arith.constant 0 : i32
    %c0_i32_0 = arith.constant 0 : i32
    %c0_i32_1 = arith.constant 0 : i32
    return %c0_i32, %c0_i32_0 : i32, i32
  }
  func.func @transform_5(%arg0: i32) -> (i32, i32) {
    %c0_i32 = arith.constant 0 : i32
    %c0_i32_0 = arith.constant 0 : i32
    %c0_i32_1 = arith.constant 0 : i32
    return %c0_i32, %c0_i32_0 : i32, i32
  }
  func.func @transform_6(%arg0: i32) -> (i32, i32) {
    %c0_i32 = arith.constant 0 : i32
    %c0_i32_0 = arith.constant 0 : i32
    %c0_i32_1 = arith.constant 0 : i32
    return %c0_i32, %c0_i32_0 : i32, i32
  }
  func.func @transform_7(%arg0: i32) -> (i32, i32) {
    %c0_i32 = arith.constant 0 : i32
    %c0_i32_0 = arith.constant 0 : i32
    %c0_i32_1 = arith.constant 0 : i32
    return %c0_i32, %c0_i32_0 : i32, i32
  }
  func.func @transform_8(%arg0: i32) -> (i32, i32) {
    %c0_i32 = arith.constant 0 : i32
    %c0_i32_0 = arith.constant 0 : i32
    %c0_i32_1 = arith.constant 0 : i32
    return %c0_i32, %c0_i32_0 : i32, i32
  }
  func.func @transform_9(%arg0: i32) -> (i32, i32) {
    %c0_i32 = arith.constant 0 : i32
    %c0_i32_0 = arith.constant 0 : i32
    return %arg0, %c0_i32 : i32, i32
  }
}

</mosaic_0001>

<bundles_post_ra>
// kernel: tpu_custom_call.1
= control target key start
LH: loop header
LB: loop body
LE: loop exit
PB: predicated region body
PF: predicated region fallthrough
CT: control target
= control target key end

     0   :  { %14 = vsyncpa [#allocation4], 0  ;;  %s1759_s0 = inlined_call_operand.hbm [shape: f32[32,128], index: 0, kind: input, shape index: {}]   ;;  %s1760_s1 = inlined_call_operand.hbm [shape: f32[1,128], index: 1, kind: input, shape index: {}]   ;;  %s1761_s2 = inlined_call_operand.vmem [shape: f32[1,128], index: 2, kind: input, shape index: {}]   ;;  %s1762_s3 = inlined_call_operand.hbm [shape: bf16[128,512], index: 3, kind: input, shape index: {}]   ;;  %s1763_s4 = inlined_call_operand.hbm [shape: f32[1,512], index: 4, kind: input, shape index: {}]   ;;  %s1764_s5 = inlined_call_operand.hbm [shape: bf16[512,128], index: 5, kind: input, shape index: {}]   ;;  %s1765_s6 = inlined_call_operand.vmem [shape: f32[1,128], index: 6, kind: input, shape index: {}]   ;;  %s1766_s7 = inlined_call_operand.vmem [shape: f32[1,128], index: 7, kind: input, shape index: {}]   ;;  %s1767_s8 = inlined_call_operand.vmem [shape: f32[1,128], index: 8, kind: input, shape index: {}]   ;;  %s1768_s9 = inlined_call_operand.hbm [shape: f32[32,128], index: 9, kind: output, shape index: {}]  }
   0x1   :  { %15 = vsyncpa [#allocation7], 0 }
   0x2   :  { %16 = vsyncpa [#allocation10], 0  ;;  %s36_s11 = sshll.u32 %s1760_s1, 4  ;;  %s37_s11 = int_to_ptr.hbm [resolvable:$true] %s36_s11 }
   0x3   :  { %17 = vsyncpa [#allocation5], 0  ;;  %s1515_s12 = smov [#allocation6]   ;;  %s62_s16 = sshll.u32 %s1763_s4, 4  ;;  %s63_s16 = int_to_ptr.hbm [resolvable:$true] %s62_s16 }
   0x4   :  { %s38_s13 = sshll.u32 %s1515_s12, 4  ;;  %s1516_s17 = smov [#allocation9]   ;;  %s39_s13 = int_to_ptr.vmem [resolvable:$true] %s38_s13 }
   0x5   :  { %41 = dma.hbm_to_vmem [thread:$0]  %s37_s11, 16, %s39_s13, [#allocation7]  }
   0x6   :  { %s64_s18 = sshll.u32 %s1516_s17, 4  ;;  %s22_s21 = sshll.u32 %s1759_s0, 4  ;;  %s65_s18 = int_to_ptr.vmem [resolvable:$true] %s64_s18  ;;  %s23_s21 = int_to_ptr.hbm [resolvable:$true] %s22_s21 }
   0x7   :  { %67 = dma.hbm_to_vmem [thread:$0]  %s63_s16, 64, %s65_s18, [#allocation10]  }
   0x8   :  { %s1517_s1 = smov [#allocation3]   ;;  %s48_s25 = sshll.u32 %s1762_s3, 4  ;;  %s49_s25 = int_to_ptr.hbm [resolvable:$true] %s48_s25 }
   0x9   :  { %s24_s22 = sshll.u32 %s1517_s1, 4  ;;  %s1518_s26 = smov 128   ;;  %s25_s22 = int_to_ptr.vmem [resolvable:$true] %s24_s22 }
   0xa   :  { %s1519_s4 = smov 8   ;;  %s1520_s27 = smov [#allocation8]  }
   0xb   :  { %30 = dma.hbm_to_vmem [thread:$0]  %s23_s21, 512, %s25_s22, [#allocation4], %s1518_s26, %s1518_s26, %s1519_s4  }
   0xc   :  { %s50_s28 = sshll.u32 %s1520_s27, 4  ;;  %s1521_s0 = smov 256   ;;  %s51_s28 = int_to_ptr.vmem [resolvable:$true] %s50_s28 }
   0xd   :  { %s1522_s29 = smov 16   ;;  %s72_s11 = sshll.u32 %s1764_s5, 4  ;;  %s73_s11 = int_to_ptr.hbm [resolvable:$true] %s72_s11 }
   0xe   :  { %56 = dma.hbm_to_vmem [thread:$0]  %s49_s25, 4096, %s51_s28, [#allocation7], %s1521_s0, %s1521_s0, %s1522_s29  }
   0xf   :  { %s1523_s12 = smov [#allocation11]   ;;  %s1524_s13 = smov 64  }
  0x10   :  { %s74_s3 = sshll.u32 %s1523_s12, 4  ;;  %s1525_s14 = smov 4   ;;  %s75_s3 = int_to_ptr.vmem [resolvable:$true] %s74_s3 }
  0x11   :  { %80 = dma.hbm_to_vmem [thread:$0]  %s73_s11, 4096, %s75_s3, [#allocation10], %s1524_s13, %s1524_s13, %s1525_s14  }
  0x12   :  { %1507 = dma.done.wait [#allocation4], 512  }
  0x13   :  { %1508 = vsyncadd [#allocation4], 4294966784 }
  0x14   :  { %1509 = dma.done.wait [#allocation7], 4112  }
  0x15   :  { %1510 = vsyncadd [#allocation7], 4294963184 }
  0x16   :  { %1511 = dma.done.wait [#allocation10], 4160  }
  0x17   :  { %1512 = vsyncadd [#allocation10], 4294963136  ;;  %v1596_v0 = vld [vmem:[#allocation3] sm:$0xff]  ;;  %v1598_v1 = vld [vmem:[#allocation3 + $0x10] sm:$0xff]  ;;  %v1526_v8 = vmov 128.0   ;;  %s992_s1 = sshll.u32 %s1768_s9, 4  ;;  %s993_s1 = int_to_ptr.hbm [resolvable:$true] %s992_s1 }
  0x18   :  { %111 = vadd.xlane.f32.xlu0 %v1596_v0  ;;  %v130_v2 = vmul.f32 %v1596_v0, %v1596_v0  ;;  %115 = vadd.xlane.f32.xlu2 %v1598_v1  ;;  %v1604_v3 = vld [vmem:[#allocation3 + $0x8] sm:$0xff]  ;;  %v1606_v4 = vld [vmem:[#allocation3 + $0x18] sm:$0xff]  ;;  %v132_v6 = vmul.f32 %v1598_v1, %v1598_v1  ;;  %1345 = vrcp.f32 %v1526_v8  ;;  %v1121_v10 = vld [vmem:[#allocation8 + $0xe0] sm:$0xf] }
  0x19   :  { %v131_v5 = vmul.f32 %v1604_v3, %v1604_v3  ;;  %v133_v7 = vmul.f32 %v1606_v4, %v1606_v4  ;;  %v1293_v11 = vld [vmem:[#allocation8 + $0xec] sm:$0xf0]  ;;  %v1291_v12 = vld [vmem:[#allocation8 + $0xe4] sm:$0xf]  ;;  %v1123_v14 = vld [vmem:[#allocation8 + $0xf0] sm:$0xf0] }
  0x1a   :  { %134 = vadd.xlane.f32.xlu1 %v130_v2  ;;  %v1122_v13 = vor.u32 %v1293_v11, %v1121_v10  ;;  %v1129_v15 = vld [vmem:[#allocation8 + $0xe8] sm:$0xf]  ;;  %v1294_v16 = vld [vmem:[#allocation8 + $0xf4] sm:$0xf0]  ;;  %v1126_v17 = vor.u32 %v1291_v12, %v1123_v14  ;;  %v1292_v19 = vld [vmem:[#allocation8 + $0xec] sm:$0xf] }
  0x1b   :  { %v1130_v18 = vor.u32 %v1294_v16, %v1129_v15  ;;  %v1131_v20 = vld [vmem:[#allocation8 + $0xf8] sm:$0xf0]  ;;  %v1105_v23 = vld [vmem:[#allocation8 + $0xc0] sm:$0xf]  ;;  %v1289_v24 = vld [vmem:[#allocation8 + $0xcc] sm:$0xf0] }
  0x1c   :  { %426 = vmatpush.bf16.msra.mxu0 %v1122_v13  ;;  %v1134_v22 = vor.u32 %v1292_v19, %v1131_v20  ;;  %445 = vmatpush.bf16.msra.mxu1 %v1126_v17  ;;  %v1287_v25 = vld [vmem:[#allocation8 + $0xc4] sm:$0xf]  ;;  %v1106_v26 = vor.u32 %v1289_v24, %v1105_v23  ;;  %v1107_v27 = vld [vmem:[#allocation8 + $0xd0] sm:$0xf0]  ;;  %v1113_v28 = vld [vmem:[#allocation8 + $0xc8] sm:$0xf] }
  0x1d   :  { %464 = vmatpush.bf16.msra.mxu2 %v1130_v18  ;;  %v1290_v29 = vld [vmem:[#allocation8 + $0xd4] sm:$0xf0]  ;;  %v1110_v30 = vor.u32 %v1287_v25, %v1107_v27  ;;  %v1288_v32 = vld [vmem:[#allocation8 + $0xcc] sm:$0xf]  ;;  %v1115_v33 = vld [vmem:[#allocation8 + $0xd8] sm:$0xf0] }
  0x1e   :  { %v1616_v9 = vpop.eup %1345  ;;  %483 = vmatpush.bf16.msra.mxu3 %v1134_v22  ;;  %v1114_v31 = vor.u32 %v1290_v29, %v1113_v28  ;;  %v1118_v35 = vor.u32 %v1288_v32, %v1115_v33  ;;  %v1089_v36 = vld [vmem:[#allocation8 + $0xa0] sm:$0xf]  ;;  %v1285_v37 = vld [vmem:[#allocation8 + $0xac] sm:$0xf0]  ;;  %v1283_v38 = vld [vmem:[#allocation8 + $0xa4] sm:$0xf] }
  0x1f   :  { %v120_v21 = vmul.f32 128.0, %v1616_v9  ;;  %v1090_v39 = vor.u32 %v1285_v37, %v1089_v36  ;;  %v1091_v40 = vld [vmem:[#allocation8 + $0xb0] sm:$0xf0]  ;;  %v1097_v41 = vld [vmem:[#allocation8 + $0xa8] sm:$0xf]  ;;  %vm124_vm0 = vweird.f32 %v1616_v9 }
  0x20   :  { %113 = vadd.xlane.f32.xlu0 %v1604_v3  ;;  %117 = vadd.xlane.f32.xlu2 %v1606_v4  ;;  %v1286_v42 = vld [vmem:[#allocation8 + $0xb4] sm:$0xf0]  ;;  %v1094_v43 = vor.u32 %v1283_v38, %v1091_v40  ;;  %v1284_v45 = vld [vmem:[#allocation8 + $0xac] sm:$0xf]  ;;  %v1099_v46 = vld [vmem:[#allocation8 + $0xb8] sm:$0xf0] }
  0x21   :  { %v121_v34 = vsub.f32 1.0, %v120_v21  ;;  %427 = vmatpush.bf16.msra.mxu0 %v1106_v26  ;;  %446 = vmatpush.bf16.msra.mxu1 %v1110_v30  ;;  %v1098_v44 = vor.u32 %v1286_v42, %v1097_v41  ;;  %v1102_v47 = vor.u32 %v1284_v45, %v1099_v46  ;;  %v1073_v48 = vld [vmem:[#allocation8 + $0x80] sm:$0xf]  ;;  %v1281_v49 = vld [vmem:[#allocation8 + $0x8c] sm:$0xf0] }
  0x22   :  { %136 = vadd.xlane.f32.xlu1 %v131_v5  ;;  %465 = vmatpush.bf16.msra.mxu2 %v1114_v31  ;;  %v1279_v50 = vld [vmem:[#allocation8 + $0x84] sm:$0xf]  ;;  %v1074_v52 = vor.u32 %v1281_v49, %v1073_v48  ;;  %v1075_v53 = vld [vmem:[#allocation8 + $0x90] sm:$0xf0]  ;;  %v1081_v54 = vld [vmem:[#allocation8 + $0x88] sm:$0xf] }
  0x23   :  { %484 = vmatpush.bf16.msra.mxu3 %v1118_v35  ;;  %v122_v51 = vmul.f32 %v1616_v9, %v121_v34  ;;  %v1282_v55 = vld [vmem:[#allocation8 + $0x94] sm:$0xf0]  ;;  %v1078_v56 = vor.u32 %v1279_v50, %v1075_v53  ;;  %v1280_v58 = vld [vmem:[#allocation8 + $0x8c] sm:$0xf]  ;;  %v1083_v59 = vld [vmem:[#allocation8 + $0x98] sm:$0xf0] }
  0x24   :  { %v1082_v57 = vor.u32 %v1282_v55, %v1081_v54  ;;  %v1086_v60 = vor.u32 %v1280_v58, %v1083_v59  ;;  %v1057_v61 = vld [vmem:[#allocation8 + $0x60] sm:$0xf]  ;;  %v1277_v62 = vld [vmem:[#allocation8 + $0x6c] sm:$0xf0]  ;;  %v1275_v63 = vld [vmem:[#allocation8 + $0x64] sm:$0xf] }
  0x25   :  { %428 = vmatpush.bf16.msra.mxu0 %v1090_v39  ;;  %447 = vmatpush.bf16.msra.mxu1 %v1094_v43  ;;  %v123_v2 = vadd.f32 %v1616_v9, %v122_v51  ;;  %v1058_v5 = vor.u32 %v1277_v62, %v1057_v61  ;;  %v1278_v8 = vld [vmem:[#allocation8 + $0x74] sm:$0xf0]  ;;  %v1276_v12 = vld [vmem:[#allocation8 + $0x6c] sm:$0xf]  ;;  %v1067_v13 = vld [vmem:[#allocation8 + $0x78] sm:$0xf0] }
  0x26   :  { %466 = vmatpush.bf16.msra.mxu2 %v1098_v44  ;;  %v1070_v14 = vor.u32 %v1276_v12, %v1067_v13  ;;  %v1041_v15 = vld [vmem:[#allocation8 + $0x40] sm:$0xf]  ;;  %v1273_v16 = vld [vmem:[#allocation8 + $0x4c] sm:$0xf0]  ;;  %v1271_v17 = vld [vmem:[#allocation8 + $0x44] sm:$0xf] }
  0x27   :  { %485 = vmatpush.bf16.msra.mxu3 %v1102_v47  ;;  %v1623_v18 = vsel %vm124_vm0, %v1616_v9, %v123_v2  ;;  %v1042_v19 = vor.u32 %v1273_v16, %v1041_v15  ;;  %v1043_v20 = vld [vmem:[#allocation8 + $0x50] sm:$0xf0]  ;;  %v1049_v21 = vld [vmem:[#allocation8 + $0x48] sm:$0xf]  ;;  %v1274_v22 = vld [vmem:[#allocation8 + $0x54] sm:$0xf0] }
  0x28   :  { %138 = vadd.xlane.f32.xlu0 %v132_v6  ;;  %v1059_v6 = vld [vmem:[#allocation8 + $0x70] sm:$0xf0]  ;;  %v1046_v23 = vor.u32 %v1271_v17, %v1043_v20  ;;  %v1050_v24 = vor.u32 %v1274_v22, %v1049_v21  ;;  %v1272_v25 = vld [vmem:[#allocation8 + $0x4c] sm:$0xf]  ;;  %v1051_v26 = vld [vmem:[#allocation8 + $0x58] sm:$0xf0] }
  0x29   :  { %429 = vmatpush.bf16.msra.mxu0 %v1074_v52  ;;  %448 = vmatpush.bf16.msra.mxu1 %v1078_v56  ;;  %v1062_v10 = vor.u32 %v1275_v63, %v1059_v6  ;;  %v1054_v29 = vor.u32 %v1272_v25, %v1051_v26  ;;  %v1025_v9 = vld [vmem:[#allocation8 + $0x20] sm:$0xf]  ;;  %v1269_v31 = vld [vmem:[#allocation8 + $0x2c] sm:$0xf0]  ;;  %v1267_v32 = vld [vmem:[#allocation8 + $0x24] sm:$0xf] }
  0x2a   :  { %140 = vadd.xlane.f32.xlu1 %v133_v7  ;;  %467 = vmatpush.bf16.msra.mxu2 %v1082_v57  ;;  %v1065_v7 = vld [vmem:[#allocation8 + $0x68] sm:$0xf]  ;;  %v1026_v34 = vor.u32 %v1269_v31, %v1025_v9  ;;  %v1027_v35 = vld [vmem:[#allocation8 + $0x30] sm:$0xf0]  ;;  %v1270_v37 = vld [vmem:[#allocation8 + $0x34] sm:$0xf0] }
  0x2b   :  { %486 = vmatpush.bf16.msra.mxu3 %v1086_v60  ;;  %v1066_v11 = vor.u32 %v1278_v8, %v1065_v7  ;;  %v1033_v36 = vld [vmem:[#allocation8 + $0x28] sm:$0xf]  ;;  %v1268_v40 = vld [vmem:[#allocation8 + $0x2c] sm:$0xf]  ;;  %v1035_v41 = vld [vmem:[#allocation8 + $0x38] sm:$0xf0]  ;;  %v1030_v42 = vor.u32 %v1267_v32, %v1027_v35 }
  0x2c   :  { %v1034_v43 = vor.u32 %v1270_v37, %v1033_v36  ;;  %v1038_v44 = vor.u32 %v1268_v40, %v1035_v41  ;;  %v1009_v46 = vld [vmem:[#allocation8] sm:$0xf]  ;;  %v1265_v47 = vld [vmem:[#allocation8 + $0xc] sm:$0xf0]  ;;  %v1263_v48 = vld [vmem:[#allocation8 + $0x4] sm:$0xf] }
  0x2d   :  { %430 = vmatpush.bf16.msra.mxu0 %v1058_v5  ;;  %449 = vmatpush.bf16.msra.mxu1 %v1062_v10  ;;  %v1010_v49 = vor.u32 %v1265_v47, %v1009_v46  ;;  %v1011_v50 = vld [vmem:[#allocation8 + $0x10] sm:$0xf0]  ;;  %v1017_v51 = vld [vmem:[#allocation8 + $0x8] sm:$0xf]  ;;  %v1266_v52 = vld [vmem:[#allocation8 + $0x14] sm:$0xf0] }
  0x2e   :  { %468 = vmatpush.bf16.msra.mxu2 %v1066_v11  ;;  %v1014_v54 = vor.u32 %v1263_v48, %v1011_v50  ;;  %v1018_v55 = vor.u32 %v1266_v52, %v1017_v51  ;;  %v1264_v56 = vld [vmem:[#allocation8 + $0xc] sm:$0xf]  ;;  %v1019_v57 = vld [vmem:[#allocation8 + $0x18] sm:$0xf0]  ;;  %v1301_v41 = vld [vmem:[#allocation11 + $0x30] sm:$0xff] }
  0x2f   :  { %487 = vmatpush.bf16.msra.mxu3 %v1070_v14  ;;  %v1022_v59 = vor.u32 %v1264_v56, %v1019_v57  ;;  %v1318_v37 = vld [vmem:[#allocation11 + $0xb8] sm:$0xff]  ;;  %v1317_v46 = vld [vmem:[#allocation11 + $0xb0] sm:$0xff]  ;;  %v1304_v9 = vld [vmem:[#allocation11 + $0x48] sm:$0xff] }
  0x30   :  { %v1325_v47 = vld [vmem:[#allocation11 + $0xf0] sm:$0xff]  ;;  %v1341_v57 = vld [vmem:[%s1761_s2] ss:$0 sm:$0xff] }
  0x31   :  { %431 = vmatpush.bf16.msra.mxu0 %v1042_v19  ;;  %450 = vmatpush.bf16.msra.mxu1 %v1046_v23 }
  0x32   :  { %469 = vmatpush.bf16.msra.mxu2 %v1050_v24 }
  0x33   :  { %488 = vmatpush.bf16.msra.mxu3 %v1054_v29 }
  0x35   :  { %432 = vmatpush.bf16.msra.mxu0 %v1026_v34  ;;  %451 = vmatpush.bf16.msra.mxu1 %v1030_v42  ;;  %v1310_v34 = vld [vmem:[#allocation11 + $0x78] sm:$0xff]  ;;  %v1309_v42 = vld [vmem:[#allocation11 + $0x70] sm:$0xff] }
  0x36   :  { %470 = vmatpush.bf16.msra.mxu2 %v1034_v43 }
  0x37   :  { %489 = vmatpush.bf16.msra.mxu3 %v1038_v44 }
  0x39   :  { %433 = vmatpush.bf16.msra.mxu0 %v1010_v49  ;;  %452 = vmatpush.bf16.msra.mxu1 %v1014_v54  ;;  %v1308_v54 = vld [vmem:[#allocation11 + $0x68] sm:$0xff] }
  0x3a   :  { %471 = vmatpush.bf16.msra.mxu2 %v1018_v55 }
  0x3b   :  { %490 = vmatpush.bf16.msra.mxu3 %v1022_v59  ;;  %v1324_v59 = vld [vmem:[#allocation11 + $0xe8] sm:$0xff] }
  0x3d   :  { %801 = vmatpush.bf16.msrb.mxu1 %v1310_v34  ;;  %v1303_v34 = vld [vmem:[#allocation11 + $0x40] sm:$0xff] }
  0x3e   :  { %820 = vmatpush.bf16.msrb.mxu2 %v1318_v37  ;;  %v1311_v37 = vld [vmem:[#allocation11 + $0x80] sm:$0xff] }
  0x41   :  { %802 = vmatpush.bf16.msrb.mxu1 %v1309_v42 }
  0x42   :  { %821 = vmatpush.bf16.msrb.mxu2 %v1317_v46 }
  0x45   :  { %803 = vmatpush.bf16.msrb.mxu1 %v1308_v54 }
  0x8b   :  { %v112_v27 = vpop.xlane.xlu0 %111  ;;  %v116_v28 = vpop.xlane.xlu2 %115 }
  0x8c   :  { %v1626_v30 = vmul.f32 %v1623_v18, %v112_v27  ;;  %v1635_v63 = vmul.f32 %v1623_v18, %v116_v28 }
  0x8d   :  { %v135_v33 = vpop.xlane.xlu1 %134 }
  0x8e   :  { %v146_v38 = vmul.f32 %v1626_v30, %v1626_v30  ;;  %v142_v39 = vmul.f32 %v135_v33, %v1623_v18  ;;  %v148_v10 = vmul.f32 %v1635_v63, %v1635_v63  ;;  %v1302_v33 = vld [vmem:[#allocation11 + $0x38] sm:$0xff]  ;;  %v154_v36 = vsub.f32 %v1596_v0, %v1626_v30 }
  0x8f   :  { %782 = vmatpush.bf16.msrb.mxu0 %v1302_v33  ;;  %v1295_v33 = vld [vmem:[#allocation11] sm:$0xff] }
  0x90   :  { %v150_v45 = vsub.f32 %v142_v39, %v146_v38  ;;  %v1326_v38 = vld [vmem:[#allocation11 + $0xf8] sm:$0xff] }
  0x91   :  { %839 = vmatpush.bf16.msrb.mxu3 %v1326_v38  ;;  %v1319_v38 = vld [vmem:[#allocation11 + $0xc0] sm:$0xff] }
  0x92   :  { %v158_v53 = vadd.f32 1e-05, %v150_v45  ;;  %v1340_v45 = vld [vmem:[#allocation6] ss:$0 sm:$0xff] }
  0x93   :  { %v114_v58 = vpop.xlane.xlu0 %113  ;;  %v118_v62 = vpop.xlane.xlu2 %117  ;;  %783 = vmatpush.bf16.msrb.mxu0 %v1301_v41 }
  0x94   :  { %1347 = vrsqrt.f32 %v158_v53  ;;  %v1632_v60 = vmul.f32 %v1623_v18, %v114_v58  ;;  %v1641_v7 = vmul.f32 %v1623_v18, %v118_v62  ;;  %vm168_vm2 = vweird.f32 %v158_v53  ;;  %v1316_v58 = vld [vmem:[#allocation11 + $0xa8] sm:$0xff] }
  0x95   :  { %v137_v61 = vpop.xlane.xlu1 %136  ;;  %840 = vmatpush.bf16.msrb.mxu3 %v1325_v47  ;;  %822 = vmatpush.bf16.msrb.mxu2 %v1316_v58 }
  0x96   :  { %v147_v2 = vmul.f32 %v1632_v60, %v1632_v60  ;;  %v143_v5 = vmul.f32 %v137_v61, %v1623_v18  ;;  %v149_v14 = vmul.f32 %v1641_v7, %v1641_v7  ;;  %v155_v49 = vsub.f32 %v1604_v3, %v1632_v60 }
  0x98   :  { %v151_v6 = vsub.f32 %v143_v5, %v147_v2  ;;  %v1299_v2 = vld [vmem:[#allocation11 + $0x20] sm:$0xff] }
  0x99   :  { %v1307_v5 = vld [vmem:[#allocation11 + $0x60] sm:$0xff]  ;;  %841 = vmatpush.bf16.msrb.mxu3 %v1324_v59 }
  0x9a   :  { %v1348_v8 = vpop.eup %1347  ;;  %v159_v11 = vadd.f32 1e-05, %v151_v6  ;;  %804 = vmatpush.bf16.msrb.mxu1 %v1307_v5 }
  0x9b   :  { %v163_v12 = vmul.f32 %v1348_v8, %v158_v53  ;;  %v139_v13 = vpop.xlane.xlu0 %138  ;;  %vm169_vm1 = vweird.f32 %v1348_v8  ;;  %v1300_v53 = vld [vmem:[#allocation11 + $0x28] sm:$0xff] }
  0x9c   :  { %1349 = vrsqrt.f32 %v159_v11  ;;  %v144_v15 = vmul.f32 %v139_v13, %v1623_v18  ;;  %vm1655_vm3 = vmor %vm168_vm2, %vm169_vm1  ;;  %vm178_vm5 = vweird.f32 %v159_v11  ;;  %784 = vmatpush.bf16.msrb.mxu0 %v1300_v53 }
  0x9d   :  { %v164_v16 = vmul.f32 %v1348_v8, %v163_v12  ;;  %v141_v17 = vpop.xlane.xlu1 %140 }
  0x9e   :  { %v152_v19 = vsub.f32 %v144_v15, %v148_v10  ;;  %v145_v20 = vmul.f32 %v141_v17, %v1623_v18 }
  0x9f   :  { %v165_v21 = vmul.f32 0.5, %v164_v16  ;;  %v156_v16 = vsub.f32 %v1598_v1, %v1635_v63  ;;  %v1315_v1 = vld [vmem:[#allocation11 + $0xa0] sm:$0xff] }
  0xa0   :  { %v1649_v22 = vadd.f32 1e-05, %v152_v19  ;;  %v153_v23 = vsub.f32 %v145_v20, %v149_v14  ;;  %785 = vmatpush.bf16.msrb.mxu0 %v1299_v2  ;;  %v157_v14 = vsub.f32 %v1606_v4, %v1641_v7  ;;  %v1298_v7 = vld [vmem:[#allocation11 + $0x18] sm:$0xff]  ;;  %v1323_v63 = vld [vmem:[#allocation11 + $0xe0] sm:$0xff]  ;;  %823 = vmatpush.bf16.msrb.mxu2 %v1315_v1 }
  0xa1   :  { %v166_v24 = vsub.f32 1.5, %v165_v21  ;;  %842 = vmatpush.bf16.msrb.mxu3 %v1323_v63 }
  0xa2   :  { %v1350_v25 = vpop.eup %1349  ;;  %1351 = vrsqrt.f32 %v1649_v22  ;;  %v1652_v26 = vadd.f32 1e-05, %v153_v23  ;;  %vm188_vm11 = vweird.f32 %v1649_v22 }
  0xa3   :  { %v167_v27 = vmul.f32 %v1348_v8, %v166_v24  ;;  %v173_v28 = vmul.f32 %v1350_v25, %v159_v11  ;;  %vm179_vm4 = vweird.f32 %v1350_v25  ;;  %v1306_v24 = vld [vmem:[#allocation11 + $0x58] sm:$0xff] }
  0xa4   :  { %1353 = vrsqrt.f32 %v1652_v26  ;;  %vm180_vm6 = vmor %vm178_vm5, %vm179_vm4  ;;  %vm198_vm7 = vweird.f32 %v1652_v26  ;;  %786 = vmatpush.bf16.msrb.mxu0 %v1298_v7  ;;  %805 = vmatpush.bf16.msrb.mxu1 %v1306_v24 }
  0xa5   :  { %v174_v29 = vmul.f32 %v1350_v25, %v173_v28  ;;  %v171_v31 = vsel %vm1655_vm3, %v1348_v8, %v167_v27  ;;  %v1314_v27 = vld [vmem:[#allocation11 + $0x98] sm:$0xff] }
  0xa6   :  { %v202_v44 = vmul.f32 %v171_v31, %v154_v36  ;;  %v1322_v28 = vld [vmem:[#allocation11 + $0xd8] sm:$0xff]  ;;  %824 = vmatpush.bf16.msrb.mxu2 %v1314_v27  ;;  %v1313_v31 = vld [vmem:[#allocation11 + $0x90] sm:$0xff]  ;;  %v1320_v36 = vld [vmem:[#allocation11 + $0xc8] sm:$0xff] }
  0xa7   :  { %v175_v32 = vmul.f32 0.5, %v174_v29  ;;  %843 = vmatpush.bf16.msrb.mxu3 %v1322_v28  ;;  %v1296_v29 = vld [vmem:[#allocation11 + $0x8] sm:$0xff] }
  0xa8   :  { %v1661_v35 = vpop.eup %1351  ;;  %v210_v56 = vmul.f32 %v1340_v45, %v202_v44 }
  0xa9   :  { %v176_v39 = vsub.f32 1.5, %v175_v32  ;;  %v183_v40 = vmul.f32 %v1661_v35, %v1649_v22  ;;  %vm189_vm9 = vweird.f32 %v1661_v35  ;;  %v1321_v32 = vld [vmem:[#allocation11 + $0xd0] sm:$0xff] }
  0xaa   :  { %v1354_v43 = vpop.eup %1353  ;;  %v1676_v6 = vadd.f32 %v1341_v57, %v210_v56  ;;  %vm190_vm12 = vmor %vm188_vm11, %vm189_vm9  ;;  %825 = vmatpush.bf16.msrb.mxu2 %v1313_v31 }
  0xab   :  { %v177_v48 = vmul.f32 %v1350_v25, %v176_v39  ;;  %v184_v0 = vmul.f32 %v1661_v35, %v183_v40  ;;  %v193_v30 = vmul.f32 %v1354_v43, %v1652_v26  ;;  %vm199_vm8 = vweird.f32 %v1354_v43  ;;  %v1305_v26 = vld [vmem:[#allocation11 + $0x50] sm:$0xff]  ;;  %844 = vmatpush.bf16.msrb.mxu3 %v1321_v32  ;;  %v256_v39 = vld [vmem:[#allocation9] sm:$0xf] }
  0xac   :  { %vm200_vm10 = vmor %vm198_vm7, %vm199_vm8  ;;  %806 = vmatpush.bf16.msrb.mxu1 %v1305_v26  ;;  %v258_v42 = vperm.slane %v256_v39, 0 }
  0xad   :  { %v181_v50 = vsel %vm180_vm6, %v1350_v25, %v177_v48  ;;  %v185_v51 = vmul.f32 0.5, %v184_v0  ;;  %v194_v52 = vmul.f32 %v1354_v43, %v193_v30  ;;  %v1297_v25 = vld [vmem:[#allocation11 + $0x10] sm:$0xff] }
  0xae   :  { %v203_v55 = vmul.f32 %v181_v50, %v155_v49  ;;  %787 = vmatpush.bf16.msrb.mxu0 %v1297_v25  ;;  %v260_v50 = vperm.slane %v256_v39, 2 }
  0xaf   :  { %v186_v3 = vsub.f32 1.5, %v185_v51  ;;  %v195_v60 = vmul.f32 0.5, %v194_v52  ;;  %845 = vmatpush.bf16.msrb.mxu3 %v1320_v36  ;;  %v261_v51 = vperm.slane %v256_v39, 3 }
  0xb0   :  { %v211_v61 = vmul.f32 %v1340_v45, %v203_v55  ;;  %807 = vmatpush.bf16.msrb.mxu1 %v1304_v9 }
  0xb1   :  { %v196_v62 = vsub.f32 1.5, %v195_v60  ;;  %v187_v10 = vmul.f32 %v1661_v35, %v186_v3 }
  0xb2   :  { %v1678_v8 = vadd.f32 %v1341_v57, %v211_v61  ;;  %788 = vmatpush.bf16.msrb.mxu0 %v1296_v29 }
  0xb3   :  { %v197_v11 = vmul.f32 %v1354_v43, %v196_v62  ;;  %v191_v15 = vsel %vm190_vm12, %v1661_v35, %v187_v10  ;;  %v1312_v35 = vld [vmem:[#allocation11 + $0x88] sm:$0xff]  ;;  %846 = vmatpush.bf16.msrb.mxu3 %v1319_v38 }
  0xb4   :  { %v222_v12 = vpack.c.bf16 %v1678_v8, %v1676_v6  ;;  %v204_v19 = vmul.f32 %v191_v15, %v156_v16  ;;  %808 = vmatpush.bf16.msrb.mxu1 %v1303_v34  ;;  %826 = vmatpush.bf16.msrb.mxu2 %v1312_v35 }
  0xb5   :  { %v201_v13 = vsel %vm200_vm10, %v1354_v43, %v197_v11  ;;  %v259_v43 = vperm.slane %v256_v39, 1 }
  0xb6   :  { %434 = vmatmul.bf16.vlgmr.msra.gmra.mxu0 %v222_v12  ;;  %453 = vmatmul.bf16.vlgmr.msra.gmra.mxu1 %v222_v12  ;;  %v205_v17 = vmul.f32 %v201_v13, %v157_v14  ;;  %v212_v21 = vmul.f32 %v1340_v45, %v204_v19 }
  0xb7   :  { %472 = vmatmul.bf16.vlgmr.msra.gmra.mxu2 %v222_v12  ;;  %491 = vmatmul.bf16.vlgmr.msra.gmra.mxu3 %v222_v12 }
  0xb8   :  { %v213_v20 = vmul.f32 %v1340_v45, %v205_v17  ;;  %v1692_v23 = vadd.f32 %v1341_v57, %v212_v21  ;;  %789 = vmatpush.bf16.msrb.mxu0 %v1295_v33  ;;  %827 = vmatpush.bf16.msrb.mxu2 %v1311_v37 }
  0xba   :  { %v1690_v22 = vadd.f32 %v1341_v57, %v213_v20 }
  0xbc   :  { %v223_v4 = vpack.c.bf16 %v1690_v22, %v1692_v23 }
  0xc6   :  { %439 = vmatmul.bf16.gmra.mxu0 %v223_v4  ;;  %458 = vmatmul.bf16.gmra.mxu1 %v223_v4 }
  0xc7   :  { %477 = vmatmul.bf16.gmra.mxu2 %v223_v4  ;;  %496 = vmatmul.bf16.gmra.mxu3 %v223_v4 }
 0x133   :  { %v435_v40 = vpop.f32.mrf.mxu0  ;;  %v454_v41 = vpop.f32.mrf.mxu1 }
 0x134   :  { %v436_v44 = vadd.f32 %v435_v40, %v258_v42  ;;  %v455_v45 = vadd.f32 %v454_v41, %v259_v43 }
 0x136   :  { %v502_v52 = vmax.f32 %v436_v44, 0.0  ;;  %v503_v53 = vmax.f32 %v455_v45, 0.0 }
 0x13a   :  { %v473_v46 = vpop.f32.mrf.mxu2  ;;  %v492_v47 = vpop.f32.mrf.mxu3 }
 0x13b   :  { %v437_v48 = vpop.f32.mrf.mxu0  ;;  %v456_v0 = vpop.f32.mrf.mxu1  ;;  %v474_v58 = vadd.f32 %v473_v46, %v260_v50  ;;  %v493_v59 = vadd.f32 %v492_v47, %v261_v51 }
 0x13c   :  { %v438_v30 = vadd.f32 %v437_v48, %v258_v42  ;;  %v457_v49 = vadd.f32 %v456_v0, %v259_v43 }
 0x13d   :  { %v504_v10 = vmax.f32 %v474_v58, 0.0  ;;  %v505_v11 = vmax.f32 %v493_v59, 0.0 }
 0x13e   :  { %v506_v54 = vmax.f32 %v438_v30, 0.0  ;;  %v507_v55 = vmax.f32 %v457_v49, 0.0  ;;  %v1342_v30 = vld [vmem:[%s1765_s6] ss:$0 sm:$0xff] }
 0x140   :  { %v518_v56 = vpack.c.bf16 %v506_v54, %v502_v52  ;;  %v519_v57 = vpack.c.bf16 %v507_v55, %v503_v53 }
 0x142   :  { %v475_v3 = vpop.f32.mrf.mxu2  ;;  %v494_v60 = vpop.f32.mrf.mxu3  ;;  %790 = vmatmul.bf16.vlgmr.msrb.gmra.mxu0 %v518_v56  ;;  %809 = vmatmul.bf16.vlgmr.msrb.gmra.mxu1 %v519_v57 }
 0x143   :  { %v476_v61 = vadd.f32 %v475_v3, %v260_v50  ;;  %v495_v62 = vadd.f32 %v494_v60, %v261_v51  ;;  %v440_v2 = vpop.f32.mrf.mxu0  ;;  %v459_v5 = vpop.f32.mrf.mxu1 }
 0x144   :  { %v441_v16 = vadd.f32 %v440_v2, %v258_v42  ;;  %v460_v17 = vadd.f32 %v459_v5, %v259_v43 }
 0x145   :  { %v508_v12 = vmax.f32 %v476_v61, 0.0  ;;  %v509_v13 = vmax.f32 %v495_v62, 0.0 }
 0x146   :  { %v510_v1 = vmax.f32 %v441_v16, 0.0  ;;  %v511_v63 = vmax.f32 %v460_v17, 0.0 }
 0x147   :  { %v520_v14 = vpack.c.bf16 %v508_v12, %v504_v10  ;;  %v521_v15 = vpack.c.bf16 %v509_v13, %v505_v11 }
 0x149   :  { %828 = vmatmul.bf16.vlgmr.msrb.gmra.mxu2 %v520_v14  ;;  %847 = vmatmul.bf16.vlgmr.msrb.gmra.mxu3 %v521_v15 }
 0x14a   :  { %v478_v19 = vpop.f32.mrf.mxu2  ;;  %v497_v20 = vpop.f32.mrf.mxu3 }
 0x14b   :  { %v442_v21 = vpop.f32.mrf.mxu0  ;;  %v461_v4 = vpop.f32.mrf.mxu1  ;;  %v479_v29 = vadd.f32 %v478_v19, %v260_v50  ;;  %v498_v9 = vadd.f32 %v497_v20, %v261_v51 }
 0x14c   :  { %v443_v7 = vadd.f32 %v442_v21, %v258_v42  ;;  %v462_v24 = vadd.f32 %v461_v4, %v259_v43 }
 0x14d   :  { %v512_v35 = vmax.f32 %v479_v29, 0.0  ;;  %v513_v36 = vmax.f32 %v498_v9, 0.0 }
 0x14e   :  { %v514_v25 = vmax.f32 %v443_v7, 0.0  ;;  %v515_v26 = vmax.f32 %v462_v24, 0.0 }
 0x150   :  { %v522_v27 = vpack.c.bf16 %v514_v25, %v510_v1  ;;  %v523_v28 = vpack.c.bf16 %v515_v26, %v511_v63 }
 0x152   :  { %v480_v31 = vpop.f32.mrf.mxu2  ;;  %v499_v32 = vpop.f32.mrf.mxu3  ;;  %795 = vmatmul.bf16.gmra.mxu0 %v522_v27  ;;  %814 = vmatmul.bf16.gmra.mxu1 %v523_v28 }
 0x153   :  { %v481_v33 = vadd.f32 %v480_v31, %v260_v50  ;;  %v500_v34 = vadd.f32 %v499_v32, %v261_v51 }
 0x155   :  { %v516_v37 = vmax.f32 %v481_v33, 0.0  ;;  %v517_v38 = vmax.f32 %v500_v34, 0.0 }
 0x157   :  { %v524_v39 = vpack.c.bf16 %v516_v37, %v512_v35  ;;  %v525_v40 = vpack.c.bf16 %v517_v38, %v513_v36  ;;  %v1730_v38 = vld [vmem:[%s1766_s7] ss:$0 sm:$0xff]  ;;  %s1527_s7 = smov [#allocation12]  }
 0x159   :  { %833 = vmatmul.bf16.gmra.mxu2 %v524_v39  ;;  %852 = vmatmul.bf16.gmra.mxu3 %v525_v40 }
 0x1bf   :  { %v791_v41 = vpop.f32.mrf.mxu0  ;;  %v810_v42 = vpop.f32.mrf.mxu1 }
 0x1c0   :  { %v811_v43 = vadd.f32 %v810_v42, %v791_v41 }
 0x1c7   :  { %v793_v44 = vpop.f32.mrf.mxu0  ;;  %v812_v45 = vpop.f32.mrf.mxu1 }
 0x1c8   :  { %v813_v50 = vadd.f32 %v812_v45, %v793_v44 }
 0x1cc   :  { %v829_v46 = vpop.f32.mrf.mxu2  ;;  %v848_v47 = vpop.f32.mrf.mxu3 }
 0x1cd   :  { %v830_v48 = vadd.f32 %v829_v46, %v811_v43 }
 0x1cf   :  { %v849_v0 = vadd.f32 %v848_v47, %v830_v48  ;;  %v796_v56 = vpop.f32.mrf.mxu0  ;;  %v815_v57 = vpop.f32.mrf.mxu1  ;;  %v1737_v47 = vld [vmem:[%s1767_s8] ss:$0 sm:$0xff]  ;;  %s990_s8 = sshll.u32 %s1527_s7, 4  ;;  %s991_s8 = int_to_ptr.vmem [resolvable:$true] %s990_s8 }
 0x1d0   :  { %v816_v3 = vadd.f32 %v815_v57, %v796_v56 }
 0x1d1   :  { %v866_v49 = vadd.f32 %v849_v0, %v1676_v6 }
 0x1d3   :  { %v1700_v51 = vadd.f32 %v1342_v30, %v866_v49 }
 0x1d4   :  { %v831_v52 = vpop.f32.mrf.mxu2  ;;  %v850_v53 = vpop.f32.mrf.mxu3 }
 0x1d5   :  { %v832_v54 = vadd.f32 %v831_v52, %v813_v50  ;;  %878 = vadd.xlane.f32.xlu2 %v1700_v51  ;;  %v890_v55 = vmul.f32 %v1700_v51, %v1700_v51 }
 0x1d7   :  { %v851_v58 = vadd.f32 %v850_v53, %v832_v54  ;;  %894 = vadd.xlane.f32.xlu0 %v890_v55  ;;  %v798_v5 = vpop.f32.mrf.mxu0  ;;  %v817_v10 = vpop.f32.mrf.mxu1 }
 0x1d8   :  { %v818_v12 = vadd.f32 %v817_v10, %v798_v5 }
 0x1d9   :  { %v867_v59 = vadd.f32 %v851_v58, %v1678_v8 }
 0x1db   :  { %v1706_v62 = vadd.f32 %v1342_v30, %v867_v59 }
 0x1dc   :  { %v834_v60 = vpop.f32.mrf.mxu2  ;;  %v853_v6 = vpop.f32.mrf.mxu3 }
 0x1dd   :  { %v835_v61 = vadd.f32 %v834_v60, %v816_v3  ;;  %v891_v19 = vmul.f32 %v1706_v62, %v1706_v62 }
 0x1df   :  { %v854_v2 = vadd.f32 %v853_v6, %v835_v61  ;;  %880 = vadd.xlane.f32.xlu0 %v1706_v62 }
 0x1e1   :  { %v868_v11 = vadd.f32 %v854_v2, %v1692_v23 }
 0x1e3   :  { %v1710_v13 = vadd.f32 %v1342_v30, %v868_v11 }
 0x1e4   :  { %v836_v14 = vpop.f32.mrf.mxu2  ;;  %v855_v8 = vpop.f32.mrf.mxu3 }
 0x1e5   :  { %v837_v15 = vadd.f32 %v836_v14, %v818_v12  ;;  %882 = vadd.xlane.f32.xlu1 %v1710_v13  ;;  %v892_v21 = vmul.f32 %v1710_v13, %v1710_v13 }
 0x1e7   :  { %v856_v16 = vadd.f32 %v855_v8, %v837_v15 }
 0x1e9   :  { %v869_v17 = vadd.f32 %v856_v16, %v1690_v22 }
 0x1eb   :  { %v1716_v20 = vadd.f32 %v1342_v30, %v869_v17 }
 0x1ed   :  { %896 = vadd.xlane.f32.xlu1 %v891_v19  ;;  %884 = vadd.xlane.f32.xlu2 %v1716_v20  ;;  %v893_v23 = vmul.f32 %v1716_v20, %v1716_v20 }
 0x1ef   :  { %900 = vadd.xlane.f32.xlu0 %v893_v23 }
 0x1f5   :  { %898 = vadd.xlane.f32.xlu2 %v892_v21 }
 0x248   :  { %v879_v4 = vpop.xlane.xlu2 %878 }
 0x249   :  { %v886_v7 = vmul.f32 %v879_v4, %v1623_v18 }
 0x24a   :  { %v895_v22 = vpop.xlane.xlu0 %894 }
 0x24b   :  { %v906_v24 = vmul.f32 %v886_v7, %v886_v7  ;;  %v902_v1 = vmul.f32 %v895_v22, %v1623_v18  ;;  %v914_v37 = vsub.f32 %v1700_v51, %v886_v7 }
 0x24d   :  { %v910_v63 = vsub.f32 %v902_v1, %v906_v24 }
 0x24f   :  { %v918_v25 = vadd.f32 1e-05, %v910_v63 }
 0x251   :  { %1355 = vrsqrt.f32 %v918_v25  ;;  %vm928_vm14 = vweird.f32 %v918_v25 }
 0x252   :  { %v881_v9 = vpop.xlane.xlu0 %880 }
 0x253   :  { %v887_v32 = vmul.f32 %v881_v9, %v1623_v18 }
 0x255   :  { %v907_v39 = vmul.f32 %v887_v32, %v887_v32 }
 0x257   :  { %v1356_v26 = vpop.eup %1355 }
 0x258   :  { %v923_v27 = vmul.f32 %v1356_v26, %v918_v25  ;;  %v883_v28 = vpop.xlane.xlu1 %882  ;;  %vm929_vm13 = vweird.f32 %v1356_v26 }
 0x259   :  { %vm930_vm15 = vmor %vm928_vm14, %vm929_vm13  ;;  %v888_v30 = vmul.f32 %v883_v28, %v1623_v18 }
 0x25a   :  { %v924_v29 = vmul.f32 %v1356_v26, %v923_v27 }
 0x25b   :  { %v908_v54 = vmul.f32 %v888_v30, %v888_v30  ;;  %v916_v25 = vsub.f32 %v1710_v13, %v888_v30 }
 0x25c   :  { %v925_v31 = vmul.f32 0.5, %v924_v29 }
 0x25e   :  { %v926_v33 = vsub.f32 1.5, %v925_v31 }
 0x260   :  { %v927_v34 = vmul.f32 %v1356_v26, %v926_v33  ;;  %v897_v35 = vpop.xlane.xlu1 %896  ;;  %v885_v36 = vpop.xlane.xlu2 %884 }
 0x261   :  { %v903_v40 = vmul.f32 %v897_v35, %v1623_v18  ;;  %v889_v41 = vmul.f32 %v885_v36, %v1623_v18 }
 0x262   :  { %v931_v42 = vsel %vm930_vm15, %v1356_v26, %v927_v34  ;;  %v901_v43 = vpop.xlane.xlu0 %900 }
 0x263   :  { %v962_v44 = vmul.f32 %v931_v42, %v914_v37  ;;  %v911_v45 = vsub.f32 %v903_v40, %v907_v39  ;;  %v909_v46 = vmul.f32 %v889_v41, %v889_v41  ;;  %v905_v48 = vmul.f32 %v901_v43, %v1623_v18 }
 0x264   :  { %v917_v23 = vsub.f32 %v1716_v20, %v889_v41 }
 0x265   :  { %v970_v0 = vmul.f32 %v1730_v38, %v962_v44  ;;  %v919_v49 = vadd.f32 1e-05, %v911_v45  ;;  %v913_v50 = vsub.f32 %v905_v48, %v909_v46 }
 0x267   :  { %1357 = vrsqrt.f32 %v919_v49  ;;  %v978_v51 = vadd.f32 %v1737_v47, %v970_v0  ;;  %v921_v52 = vadd.f32 1e-05, %v913_v50  ;;  %vm938_vm1 = vweird.f32 %v919_v49 }
 0x268   :  { %v899_v53 = vpop.xlane.xlu2 %898 }
 0x269   :  { %v904_v55 = vmul.f32 %v899_v53, %v1623_v18  ;;  %982 = vst [vmem:[#allocation12] sm:$0xff] %v978_v51  ;;  %1359 = vrsqrt.f32 %v921_v52  ;;  %v915_v18 = vsub.f32 %v1706_v62, %v887_v32  ;;  %vm958_vm4 = vweird.f32 %v921_v52 }
 0x26b   :  { %v912_v56 = vsub.f32 %v904_v55, %v908_v54 }
 0x26d   :  { %v1358_v57 = vpop.eup %1357  ;;  %v920_v58 = vadd.f32 1e-05, %v912_v56 }
 0x26e   :  { %v933_v59 = vmul.f32 %v1358_v57, %v919_v49  ;;  %vm939_vm0 = vweird.f32 %v1358_v57 }
 0x26f   :  { %1361 = vrsqrt.f32 %v920_v58  ;;  %v1360_v3 = vpop.eup %1359  ;;  %vm940_vm2 = vmor %vm938_vm1, %vm939_vm0  ;;  %vm948_vm7 = vweird.f32 %v920_v58 }
 0x270   :  { %v934_v60 = vmul.f32 %v1358_v57, %v933_v59  ;;  %v953_v6 = vmul.f32 %v1360_v3, %v921_v52  ;;  %vm959_vm3 = vweird.f32 %v1360_v3 }
 0x271   :  { %vm960_vm5 = vmor %vm958_vm4, %vm959_vm3 }
 0x272   :  { %v935_v61 = vmul.f32 0.5, %v934_v60  ;;  %v954_v2 = vmul.f32 %v1360_v3, %v953_v6 }
 0x274   :  { %v936_v5 = vsub.f32 1.5, %v935_v61  ;;  %v955_v11 = vmul.f32 0.5, %v954_v2 }
 0x275   :  { %v1362_v10 = vpop.eup %1361 }
 0x276   :  { %v937_v12 = vmul.f32 %v1358_v57, %v936_v5  ;;  %v943_v14 = vmul.f32 %v1362_v10, %v920_v58  ;;  %v956_v15 = vsub.f32 1.5, %v955_v11  ;;  %vm949_vm6 = vweird.f32 %v1362_v10 }
 0x277   :  { %vm950_vm8 = vmor %vm948_vm7, %vm949_vm6 }
 0x278   :  { %v941_v8 = vsel %vm940_vm2, %v1358_v57, %v937_v12  ;;  %v944_v16 = vmul.f32 %v1362_v10, %v943_v14  ;;  %v957_v19 = vmul.f32 %v1360_v3, %v956_v15 }
 0x279   :  { %v963_v17 = vmul.f32 %v941_v8, %v915_v18 }
 0x27a   :  { %v945_v21 = vmul.f32 0.5, %v944_v16  ;;  %v961_v7 = vsel %vm960_vm5, %v1360_v3, %v957_v19 }
 0x27b   :  { %v971_v4 = vmul.f32 %v1730_v38, %v963_v17  ;;  %v965_v22 = vmul.f32 %v961_v7, %v917_v23 }
 0x27c   :  { %v946_v24 = vsub.f32 1.5, %v945_v21 }
 0x27d   :  { %v979_v62 = vadd.f32 %v1737_v47, %v971_v4  ;;  %v973_v1 = vmul.f32 %v1730_v38, %v965_v22 }
 0x27e   :  { %v947_v63 = vmul.f32 %v1362_v10, %v946_v24 }
 0x27f   :  { %983 = vst [vmem:[#allocation12 + $0x8] sm:$0xff] %v979_v62  ;;  %v981_v20 = vadd.f32 %v1737_v47, %v973_v1 }
 0x280   :  { %v951_v26 = vsel %vm950_vm8, %v1362_v10, %v947_v63 }
 0x281   :  { %v964_v27 = vmul.f32 %v951_v26, %v916_v25  ;;  %985 = vst [vmem:[#allocation12 + $0x18] sm:$0xff] %v981_v20 }
 0x283   :  { %v972_v28 = vmul.f32 %v1730_v38, %v964_v27 }
 0x285   :  { %v980_v29 = vadd.f32 %v1737_v47, %v972_v28 }
 0x287   :  { %984 = vst [vmem:[#allocation12 + $0x10] sm:$0xff] %v980_v29 }
 0x288   :  { %998 = dma.vmem_to_hbm [thread:$0]  %s991_s8, 512, %s993_s1, [#allocation5], %s1518_s26, %s1518_s26, %s1519_s4  }
 0x289   :  { %1513 = dma.done.wait [#allocation5], 512  }
 0x28a   :  { %1514 = vsyncadd [#allocation5], 4294966784 }
 0x28b   :  { %1003 = vsyncpa [#allocation4], 1 }
 0x28c   :  { %1004 = vsyncpa [#allocation7], 1 }
 0x28d   :  { %1005 = vsyncpa [#allocation10], 1 }
 0x28e   :  { %1006 = vsyncpa [#allocation5], 1 }

</bundles_post_ra>
